<compile_context>
chip_gen: v5e
topology: v5e:2x2
jax: 0.10.0
libtpu: 0.0.40
codegen_flags: <defaults>
</compile_context>

<pallas_src>
import functools

import jax
import jax.numpy as jnp
import numpy as np
from jax import lax
from jax.experimental import pallas as pl
from jax.experimental.pallas import tpu as pltpu

LANE = 128
SUBLANE = 8


# ----------------------------------------------------------------------------
# Pallas kernel: MiniLM forward for one block of `bb` whole sequences.
# Activations are (R, Ep) with R = bb*S rows, Ep = padded embed dim (128).
# ----------------------------------------------------------------------------
def minilm_kernel(ids_ref, emb_ref, pos_ref, wqkv_ref, bqkv_ref, wo_ref,
                  w1_ref, b1_ref, w2_ref, wout_ref, bout_ref, vecs_ref,
                  out_ref, *, embed_dim, seq_len):
    R = ids_ref.shape[0]
    Vk, Ep = emb_ref.shape
    E = embed_dim
    S = seq_len

    # --- embedding lookup as one-hot matmul (MXU, lane-dense K = Vk = 128) ---
    ids = ids_ref[...]                                             # (R, 1) int32
    col = lax.broadcasted_iota(jnp.int32, (R, Vk), 1)              # (R, Vk)
    one_hot = (ids == col).astype(jnp.float32)                     # (R, Vk)
    h = jnp.dot(one_hot, emb_ref[...],
                preferred_element_type=jnp.float32)                # (R, Ep)
    h = h + pos_ref[...]                                           # + pos encoding

    # packed per-feature vectors: [bo, ln1g, ln1b, b2, ln2g, ln2b, 0, 0]
    vecs = vecs_ref[...]                                           # (8, Ep)
    bo, ln1g, ln1b = vecs[0:1, :], vecs[1:2, :], vecs[2:3, :]
    b2, ln2g, ln2b = vecs[3:4, :], vecs[4:5, :], vecs[5:6, :]

    # lane mask over the real E features (masked *before* the mean, so the
    # statistics never depend on padded lanes being zero)
    feat_mask = (lax.broadcasted_iota(jnp.int32, (1, Ep), 1) < E
                 ).astype(jnp.float32)
    inv_e = jnp.float32(1.0 / E)

    def layer_norm(x, g, b):
        xm = x * feat_mask
        mu = jnp.sum(xm, axis=-1, keepdims=True) * inv_e
        xc = (xm - mu) * feat_mask
        var = jnp.sum(xc * xc, axis=-1, keepdims=True) * inv_e
        return xc * lax.rsqrt(var + 1e-5) * g + b

    # --- single-head self-attention, fused QKV projection -------------------
    # 1/sqrt(E) is folded into the Q third of Wqkv/bqkv at prep time.
    qkv = jnp.dot(h, wqkv_ref[...],
                  preferred_element_type=jnp.float32) + bqkv_ref[...]  # (R, 3Ep)
    q = qkv[:, :Ep]
    k = qkv[:, Ep:2 * Ep]
    v = qkv[:, 2 * Ep:]

    scores = lax.dot_general(q, k, (((1,), (1,)), ((), ())),
                             preferred_element_type=jnp.float32)   # (R, R)
    if R > S:
        # Block holds several sequences: block-diagonal mask built in-kernel
        # (static trace-time branch; skipped when one block == one sequence).
        rseq = lax.broadcasted_iota(jnp.int32, (R, R), 0) // S
        cseq = lax.broadcasted_iota(jnp.int32, (R, R), 1) // S
        scores = jnp.where(rseq == cseq, scores, jnp.float32(-1e30))
    scores = scores - jnp.max(scores, axis=-1, keepdims=True)
    p = jnp.exp(scores)
    denom = jnp.sum(p, axis=-1, keepdims=True)
    attn = p * pl.reciprocal(denom, approx=False)   # exact: (R,1) is ~free
    ctx = jnp.dot(attn, v, preferred_element_type=jnp.float32)     # (R, Ep)
    attn_out = jnp.dot(ctx, wo_ref[...],
                       preferred_element_type=jnp.float32) + bo

    h1 = layer_norm(h + attn_out, ln1g, ln1b)

    # --- feed-forward --------------------------------------------------------
    ffn_h = jnp.maximum(
        jnp.dot(h1, w1_ref[...], preferred_element_type=jnp.float32)
        + b1_ref[...], 0.0)
    ffn = jnp.dot(ffn_h, w2_ref[...],
                  preferred_element_type=jnp.float32) + b2
    h2 = layer_norm(h1 + ffn, ln2g, ln2b)

    # --- output projection (lane-dense (R, Vp) store, Vp multiple of 128) ----
    out_ref[...] = jnp.dot(h2, wout_ref[...],
                           preferred_element_type=jnp.float32) + bout_ref[...]


# ----------------------------------------------------------------------------
# One-time parameter preparation (hoisted out of the per-call forward path).
# ----------------------------------------------------------------------------
def _round_up(x, m):
    return (x + m - 1) // m * m


def _choose_seqs_per_block(batch, seq_len, *, max_rows=64, min_blocks=2):
    # Largest block that still leaves >= min_blocks parallel grid steps
    # (v7x has 2 TensorCores; 'parallel' grid axes shard across them), keeps
    # the row count modest so block-diagonal attention wastes little work,
    # and keeps blocks sublane-friendly (multiple of 8 rows).
    best = batch
    for bb in range(batch, 0, -1):
        if batch % bb:
            continue
        rows = bb * seq_len
        if rows > max_rows and bb > 1:
            continue
        if rows % SUBLANE and rows != batch * seq_len:
            continue
        best = bb
        if batch // bb >= min_blocks:
            return bb
    return best


def prepare_minilm(params, *, batch_size, seqs_per_block=None):
    """Pad to 128 lanes, fuse QKV, fold 1/sqrt(E), pack bias/LN vectors."""
    V, E = params["emb"].shape
    S = params["pos"].shape[0]
    H = params["w1"].shape[1]
    Ep, Hp, Vp = _round_up(E, LANE), _round_up(H, LANE), _round_up(V, LANE)
    Vk = _round_up(V, LANE)       # embedding rows / one-hot contraction dim

    if seqs_per_block is None:
        seqs_per_block = _choose_seqs_per_block(batch_size, S)
    bb = seqs_per_block
    assert batch_size % bb == 0
    R = bb * S

    f32 = jnp.float32

    def pad2(a, rows, cols):
        a = jnp.asarray(a, f32)
        return jnp.pad(a, ((0, rows - a.shape[0]), (0, cols - a.shape[1])))

    scale = 1.0 / float(np.sqrt(E))          # folded into the Q third of Wqkv
    wqkv = jnp.concatenate([pad2(params["wq"] * scale, Ep, Ep),
                            pad2(params["wk"], Ep, Ep),
                            pad2(params["wv"], Ep, Ep)], axis=1)      # (Ep, 3Ep)
    bqkv = jnp.concatenate([pad2(params["bq"] * scale, 1, Ep),
                            pad2(params["bk"], 1, Ep),
                            pad2(params["bv"], 1, Ep)], axis=1)       # (1, 3Ep)

    # pack all (1, Ep) vectors into one sublane-aligned (8, Ep) tile
    vecs = jnp.concatenate([pad2(params["bo"], 1, Ep),
                            pad2(params["ln1g"], 1, Ep),
                            pad2(params["ln1b"], 1, Ep),
                            pad2(params["b2"], 1, Ep),
                            pad2(params["ln2g"], 1, Ep),
                            pad2(params["ln2b"], 1, Ep),
                            jnp.zeros((2, Ep), f32)], axis=0)         # (8, Ep)

    prep = {
        "emb": pad2(params["emb"], Vk, Ep),
        "pos": jnp.tile(pad2(params["pos"], S, Ep), (bb, 1)),         # (R, Ep)
        "wqkv": wqkv, "bqkv": bqkv,
        "wo": pad2(params["wo"], Ep, Ep),
        "w1": pad2(params["w1"], Ep, Hp), "b1": pad2(params["b1"], 1, Hp),
        "w2": pad2(params["w2"], Hp, Ep),
        "wout": pad2(params["wout"], Ep, Vp),
        "bout": pad2(params["bout"], 1, Vp),
        "vecs": vecs,
    }
    cfg = {"B": batch_size, "S": S, "V": V, "E": E,
           "Ep": Ep, "Hp": Hp, "Vp": Vp, "Vk": Vk, "bb": bb, "R": R}
    return prep, cfg


# ----------------------------------------------------------------------------
# Forward: only ids reshape + pallas_call + final slice happen per call.
# ----------------------------------------------------------------------------
def minilm_forward(x, prep, cfg):
    B, S = x.shape
    assert B == cfg["B"] and S == cfg["S"]
    R, Ep, Hp, Vp, Vk = cfg["R"], cfg["Ep"], cfg["Hp"], cfg["Vp"], cfg["Vk"]
    nblocks = (B * S) // R

    ids = x.astype(jnp.int32).reshape(B * S, 1)

    def full(shape):
        # Whole-array block with a constant index map: weights stay resident in
        # VMEM across the (parallel) grid steps.
        # TODO(synk): at realistic E/H/V single-buffer these (pl.Buffered(1) /
        # scratch copy) and tile the vocab axis in bf16 for v7x's 64 MiB VMEM.
        return pl.BlockSpec(shape, lambda b, _n=len(shape): (0,) * _n)

    in_specs = [
        pl.BlockSpec((R, 1), lambda b: (b, 0)),    # token ids for this block
        full((Vk, Ep)),                            # embedding table (row-padded)
        full((R, Ep)),                             # positional encoding (tiled)
        full((Ep, 3 * Ep)), full((1, 3 * Ep)),     # fused Wqkv (Q scaled), bqkv
        full((Ep, Ep)),                            # Wo
        full((Ep, Hp)), full((1, Hp)),             # W1, b1
        full((Hp, Ep)),                            # W2
        full((Ep, Vp)), full((1, Vp)),             # Wout, bout
        full((8, Ep)),                             # packed bo/ln1/b2/ln2 vectors
    ]
    out_spec = pl.BlockSpec((R, Vp), lambda b: (b, 0))   # lane-dense logits

    kernel = functools.partial(minilm_kernel, embed_dim=cfg["E"], seq_len=S)
    logits_p = pl.pallas_call(
        kernel,
        out_shape=jax.ShapeDtypeStruct((B * S, Vp), jnp.float32),
        grid=(nblocks,),
        in_specs=in_specs,
        out_specs=out_spec,
        compiler_params=pltpu.CompilerParams(
            dimension_semantics=("parallel",)),
    )(ids, prep["emb"], prep["pos"], prep["wqkv"], prep["bqkv"], prep["wo"],
      prep["w1"], prep["b1"], prep["w2"], prep["wout"], prep["bout"],
      prep["vecs"])

    # strip vocab padding, restore (B, S, V)
    return logits_p[:, :cfg["V"]].reshape(B, S, cfg["V"])


# ----------------------------------------------------------------------------
# Pure-JAX reference (unpadded weights, explicit scale & division).
# ----------------------------------------------------------------------------
def minilm_ref(x, p):
    E = p["emb"].shape[1]
    emb = p["emb"][x]                                  # (B, S, E)
    h = emb + p["pos"][None]

    def lin(t, w, b):
        return t @ w + b

    def ln(t, g, b):
        mu = jnp.mean(t, axis=-1, keepdims=True)
        tc = t - mu
        var = jnp.mean(tc * tc, axis=-1, keepdims=True)
        return tc * lax.rsqrt(var + 1e-5) * g + b

    q = lin(h, p["wq"], p["bq"])
    k = lin(h, p["wk"], p["bk"])
    v = lin(h, p["wv"], p["bv"])
    scores = jnp.einsum("bsd,btd->bst", q, k) / jnp.sqrt(jnp.float32(E))
    scores = scores - jnp.max(scores, axis=-1, keepdims=True)
    pr = jnp.exp(scores)
    attn = pr / jnp.sum(pr, axis=-1, keepdims=True)
    ctx = jnp.einsum("bst,btd->bsd", attn, v)
    h1 = ln(h + lin(ctx, p["wo"], p["bo"]), p["ln1g"], p["ln1b"])
    ffn = lin(jnp.maximum(lin(h1, p["w1"], p["b1"]), 0.0), p["w2"], p["b2"])
    h2 = ln(h1 + ffn, p["ln2g"], p["ln2b"])
    return lin(h2, p["wout"], p["bout"])


# ----------------------------------------------------------------------------
# Deterministic parameter construction (synthetic init, no checkpoint).
# ----------------------------------------------------------------------------
def make_params(key, vocab_size, embed_dim, hidden_dim, seq_length):
    V, E, H, S = vocab_size, embed_dim, hidden_dim, seq_length
    ks = jax.random.split(key, 16)

    def w(k, shape, s=0.1):
        return (jax.random.normal(k, shape) * s).astype(jnp.float32)

    return {
        "emb":  w(ks[0], (V, E)),
        "pos":  w(ks[1], (S, E), 0.02),
        "wq":   w(ks[2], (E, E)), "bq": w(ks[3], (1, E), 0.01),
        "wk":   w(ks[4], (E, E)), "bk": w(ks[5], (1, E), 0.01),
        "wv":   w(ks[6], (E, E)), "bv": w(ks[7], (1, E), 0.01),
        "wo":   w(ks[8], (E, E)), "bo": w(ks[9], (1, E), 0.01),
        "ln1g": jnp.ones((1, E), jnp.float32), "ln1b": jnp.zeros((1, E), jnp.float32),
        "w1":   w(ks[10], (E, H)), "b1": w(ks[11], (1, H), 0.01),
        "w2":   w(ks[12], (H, E)), "b2": w(ks[13], (1, E), 0.01),
        "ln2g": jnp.ones((1, E), jnp.float32), "ln2b": jnp.zeros((1, E), jnp.float32),
        "wout": w(ks[14], (E, V)), "bout": w(ks[15], (1, V), 0.01),
    }


if __name__ == "__main__":
    VOCAB, EMBED, HIDDEN, SEQ, BATCH = 64, 32, 64, 8, 2

    key = jax.random.PRNGKey(0)
    pkey, xkey = jax.random.split(key)
    params = make_params(pkey, VOCAB, EMBED, HIDDEN, SEQ)
    x = jax.random.randint(xkey, (BATCH, SEQ), 0, VOCAB, dtype=jnp.int32)

    # one-time weight prep (padding / QKV fusion / scale fold / vector packing)
    prep, cfg = prepare_minilm(params, batch_size=BATCH)
    prep = jax.block_until_ready(prep)

    logits = jax.block_until_ready(minilm_forward(x, prep, cfg))

    ref = jax.block_until_ready(minilm_ref(x, params))
    # tolerance covers default-precision MXU f32 matmul passes in the kernel
    # vs. the XLA reference path (the softmax reciprocal is now exact)
    np.testing.assert_allclose(np.asarray(logits), np.asarray(ref),
                               rtol=5e-3, atol=5e-3)

    assert logits.shape == (BATCH, SEQ, VOCAB)
    print("KERNEL_OK")
</pallas_src>

<mosaic_0001>
module attributes {stable_mosaic.version = 11 : i64} {
  func.func @minilm_kernel(%arg0: i32, %arg1: memref<8x1xi32, #tpu.memory_space<vmem>>, %arg2: memref<128x128xf32, #tpu.memory_space<vmem>>, %arg3: memref<8x128xf32, #tpu.memory_space<vmem>>, %arg4: memref<128x384xf32, #tpu.memory_space<vmem>>, %arg5: memref<1x384xf32, #tpu.memory_space<vmem>>, %arg6: memref<128x128xf32, #tpu.memory_space<vmem>>, %arg7: memref<128x128xf32, #tpu.memory_space<vmem>>, %arg8: memref<1x128xf32, #tpu.memory_space<vmem>>, %arg9: memref<128x128xf32, #tpu.memory_space<vmem>>, %arg10: memref<128x128xf32, #tpu.memory_space<vmem>>, %arg11: memref<1x128xf32, #tpu.memory_space<vmem>>, %arg12: memref<8x128xf32, #tpu.memory_space<vmem>>, %arg13: memref<8x128xf32, #tpu.memory_space<vmem>>) attributes {dimension_semantics = [#tpu.dimension_semantics<parallel>], iteration_bounds = array<i64: 2>, scalar_prefetch = 0 : i64, scratch_operands = 0 : i64, tpu.core_type = #tpu.core_type<tc>, window_params = [{transform_indices = @transform_0, window_bounds = array<i64: 8, 1>}, {pipeline_mode = #tpu.pipeline_mode<synchronous>, transform_indices = @transform_1, window_bounds = array<i64: 128, 128>}, {pipeline_mode = #tpu.pipeline_mode<synchronous>, transform_indices = @transform_2, window_bounds = array<i64: 8, 128>}, {pipeline_mode = #tpu.pipeline_mode<synchronous>, transform_indices = @transform_3, window_bounds = array<i64: 128, 384>}, {pipeline_mode = #tpu.pipeline_mode<synchronous>, transform_indices = @transform_4, window_bounds = array<i64: 1, 384>}, {pipeline_mode = #tpu.pipeline_mode<synchronous>, transform_indices = @transform_5, window_bounds = array<i64: 128, 128>}, {pipeline_mode = #tpu.pipeline_mode<synchronous>, transform_indices = @transform_6, window_bounds = array<i64: 128, 128>}, {pipeline_mode = #tpu.pipeline_mode<synchronous>, transform_indices = @transform_7, window_bounds = array<i64: 1, 128>}, {pipeline_mode = #tpu.pipeline_mode<synchronous>, transform_indices = @transform_8, window_bounds = array<i64: 128, 128>}, {pipeline_mode = #tpu.pipeline_mode<synchronous>, transform_indices = @transform_9, window_bounds = array<i64: 128, 128>}, {pipeline_mode = #tpu.pipeline_mode<synchronous>, transform_indices = @transform_10, window_bounds = array<i64: 1, 128>}, {pipeline_mode = #tpu.pipeline_mode<synchronous>, transform_indices = @transform_11, window_bounds = array<i64: 8, 128>}, {transform_indices = @transform_12, window_bounds = array<i64: 8, 128>}]} {
    %c0 = arith.constant 0 : index
    %c0_0 = arith.constant 0 : index
    %0 = vector.load %arg1[%c0, %c0_0] : memref<8x1xi32, #tpu.memory_space<vmem>>, vector<8x1xi32>
    %1 = tpu.iota {dimensions = array<i32: 1>} : vector<8x128xi32>
    %2 = vector.broadcast %0 : vector<8x1xi32> to vector<8x128xi32>
    %3 = arith.cmpi eq, %2, %1 : vector<8x128xi32>
    %4 = arith.extui %3 : vector<8x128xi1> to vector<8x128xi32>
    %5 = arith.sitofp %4 : vector<8x128xi32> to vector<8x128xf32>
    %c0_1 = arith.constant 0 : index
    %c0_2 = arith.constant 0 : index
    %6 = vector.load %arg2[%c0_1, %c0_2] : memref<128x128xf32, #tpu.memory_space<vmem>>, vector<128x128xf32>
    %cst = arith.constant dense<0.000000e+00> : vector<8x128xf32>
    %7 = tpu.matmul %5, %6, %cst {dimension_numbers = #tpu.dot_dimension_numbers<[1], [0], [0], [1], [0, 0, 1, 1], [], []>} : vector<8x128xf32>, vector<128x128xf32>, vector<8x128xf32> -> vector<8x128xf32>
    %c0_3 = arith.constant 0 : index
    %c0_4 = arith.constant 0 : index
    %8 = vector.load %arg3[%c0_3, %c0_4] : memref<8x128xf32, #tpu.memory_space<vmem>>, vector<8x128xf32>
    %9 = arith.addf %7, %8 : vector<8x128xf32>
    %c0_5 = arith.constant 0 : index
    %c0_6 = arith.constant 0 : index
    %10 = vector.load %arg12[%c0_5, %c0_6] : memref<8x128xf32, #tpu.memory_space<vmem>>, vector<8x128xf32>
    %11 = vector.extract_strided_slice %10 {offsets = [0, 0], sizes = [1, 128], strides = [1, 1]} : vector<8x128xf32> to vector<1x128xf32>
    %12 = vector.extract_strided_slice %10 {offsets = [1, 0], sizes = [1, 128], strides = [1, 1]} : vector<8x128xf32> to vector<1x128xf32>
    %13 = vector.extract_strided_slice %10 {offsets = [2, 0], sizes = [1, 128], strides = [1, 1]} : vector<8x128xf32> to vector<1x128xf32>
    %14 = vector.extract_strided_slice %10 {offsets = [3, 0], sizes = [1, 128], strides = [1, 1]} : vector<8x128xf32> to vector<1x128xf32>
    %15 = vector.extract_strided_slice %10 {offsets = [4, 0], sizes = [1, 128], strides = [1, 1]} : vector<8x128xf32> to vector<1x128xf32>
    %16 = vector.extract_strided_slice %10 {offsets = [5, 0], sizes = [1, 128], strides = [1, 1]} : vector<8x128xf32> to vector<1x128xf32>
    %17 = tpu.iota {dimensions = array<i32: 1>} : vector<1x128xi32>
    %c32_i32 = arith.constant 32 : i32
    %18 = vector.broadcast %c32_i32 : i32 to vector<1x128xi32>
    %19 = arith.cmpi slt, %17, %18 : vector<1x128xi32>
    %20 = arith.extui %19 : vector<1x128xi1> to vector<1x128xi32>
    %21 = arith.sitofp %20 : vector<1x128xi32> to vector<1x128xf32>
    %c0_7 = arith.constant 0 : index
    %c0_8 = arith.constant 0 : index
    %22 = vector.load %arg4[%c0_7, %c0_8] : memref<128x384xf32, #tpu.memory_space<vmem>>, vector<128x384xf32>
    %cst_9 = arith.constant dense<0.000000e+00> : vector<8x384xf32>
    %23 = tpu.matmul %9, %22, %cst_9 {dimension_numbers = #tpu.dot_dimension_numbers<[1], [0], [0], [1], [0, 0, 1, 1], [], []>} : vector<8x128xf32>, vector<128x384xf32>, vector<8x384xf32> -> vector<8x384xf32>
    %c0_10 = arith.constant 0 : index
    %c0_11 = arith.constant 0 : index
    %24 = vector.load %arg5[%c0_10, %c0_11] : memref<1x384xf32, #tpu.memory_space<vmem>>, vector<1x384xf32>
    %25 = vector.broadcast %24 : vector<1x384xf32> to vector<8x384xf32>
    %26 = arith.addf %23, %25 : vector<8x384xf32>
    %27 = vector.extract_strided_slice %26 {offsets = [0, 0], sizes = [8, 128], strides = [1, 1]} : vector<8x384xf32> to vector<8x128xf32>
    %28 = vector.extract_strided_slice %26 {offsets = [0, 128], sizes = [8, 128], strides = [1, 1]} : vector<8x384xf32> to vector<8x128xf32>
    %29 = vector.extract_strided_slice %26 {offsets = [0, 256], sizes = [8, 128], strides = [1, 1]} : vector<8x384xf32> to vector<8x128xf32>
    %cst_12 = arith.constant dense<0.000000e+00> : vector<8x8xf32>
    %30 = tpu.matmul %27, %28, %cst_12 {dimension_numbers = #tpu.dot_dimension_numbers<[1], [1], [0], [0], [0, 0, 1, 0], [], []>} : vector<8x128xf32>, vector<8x128xf32>, vector<8x8xf32> -> vector<8x8xf32>
    %cst_13 = arith.constant dense<0xFF800000> : vector<8xf32>
    %31 = vector.multi_reduction <maximumf>, %30, %cst_13 [1] : vector<8x8xf32> to vector<8xf32>
    %32 = vector.shape_cast %31 : vector<8xf32> to vector<8x1xf32>
    %33 = vector.broadcast %32 : vector<8x1xf32> to vector<8x8xf32>
    %34 = arith.subf %30, %33 : vector<8x8xf32>
    %35 = math.exp %34 : vector<8x8xf32>
    %cst_14 = arith.constant dense<0.000000e+00> : vector<8xf32>
    %36 = vector.multi_reduction <add>, %35, %cst_14 [1] : vector<8x8xf32> to vector<8xf32>
    %37 = vector.shape_cast %36 : vector<8xf32> to vector<8x1xf32>
    %38 = tpu.reciprocal %37 : vector<8x1xf32> -> vector<8x1xf32>
    %39 = vector.broadcast %38 : vector<8x1xf32> to vector<8x8xf32>
    %40 = arith.mulf %35, %39 : vector<8x8xf32>
    %cst_15 = arith.constant dense<0.000000e+00> : vector<8x128xf32>
    %41 = tpu.matmul %40, %29, %cst_15 {dimension_numbers = #tpu.dot_dimension_numbers<[1], [0], [0], [1], [0, 0, 1, 1], [], []>} : vector<8x8xf32>, vector<8x128xf32>, vector<8x128xf32> -> vector<8x128xf32>
    %c0_16 = arith.constant 0 : index
    %c0_17 = arith.constant 0 : index
    %42 = vector.load %arg6[%c0_16, %c0_17] : memref<128x128xf32, #tpu.memory_space<vmem>>, vector<128x128xf32>
    %cst_18 = arith.constant dense<0.000000e+00> : vector<8x128xf32>
    %43 = tpu.matmul %41, %42, %cst_18 {dimension_numbers = #tpu.dot_dimension_numbers<[1], [0], [0], [1], [0, 0, 1, 1], [], []>} : vector<8x128xf32>, vector<128x128xf32>, vector<8x128xf32> -> vector<8x128xf32>
    %44 = vector.broadcast %11 : vector<1x128xf32> to vector<8x128xf32>
    %45 = arith.addf %43, %44 : vector<8x128xf32>
    %46 = arith.addf %9, %45 : vector<8x128xf32>
    %47 = vector.broadcast %21 : vector<1x128xf32> to vector<8x128xf32>
    %48 = arith.mulf %46, %47 : vector<8x128xf32>
    %cst_19 = arith.constant dense<0.000000e+00> : vector<8xf32>
    %49 = vector.multi_reduction <add>, %48, %cst_19 [1] : vector<8x128xf32> to vector<8xf32>
    %50 = vector.shape_cast %49 : vector<8xf32> to vector<8x1xf32>
    %cst_20 = arith.constant 3.125000e-02 : f32
    %51 = vector.broadcast %cst_20 : f32 to vector<8x1xf32>
    %52 = arith.mulf %50, %51 : vector<8x1xf32>
    %53 = vector.broadcast %52 : vector<8x1xf32> to vector<8x128xf32>
    %54 = arith.subf %48, %53 : vector<8x128xf32>
    %55 = vector.broadcast %21 : vector<1x128xf32> to vector<8x128xf32>
    %56 = arith.mulf %54, %55 : vector<8x128xf32>
    %57 = arith.mulf %56, %56 : vector<8x128xf32>
    %cst_21 = arith.constant dense<0.000000e+00> : vector<8xf32>
    %58 = vector.multi_reduction <add>, %57, %cst_21 [1] : vector<8x128xf32> to vector<8xf32>
    %59 = vector.shape_cast %58 : vector<8xf32> to vector<8x1xf32>
    %cst_22 = arith.constant 3.125000e-02 : f32
    %60 = vector.broadcast %cst_22 : f32 to vector<8x1xf32>
    %61 = arith.mulf %59, %60 : vector<8x1xf32>
    %cst_23 = arith.constant 9.99999974E-6 : f32
    %62 = vector.broadcast %cst_23 : f32 to vector<8x1xf32>
    %63 = arith.addf %61, %62 : vector<8x1xf32>
    %64 = math.rsqrt %63 : vector<8x1xf32>
    %65 = vector.broadcast %64 : vector<8x1xf32> to vector<8x128xf32>
    %66 = arith.mulf %56, %65 : vector<8x128xf32>
    %67 = vector.broadcast %12 : vector<1x128xf32> to vector<8x128xf32>
    %68 = arith.mulf %66, %67 : vector<8x128xf32>
    %69 = vector.broadcast %13 : vector<1x128xf32> to vector<8x128xf32>
    %70 = arith.addf %68, %69 : vector<8x128xf32>
    %c0_24 = arith.constant 0 : index
    %c0_25 = arith.constant 0 : index
    %71 = vector.load %arg7[%c0_24, %c0_25] : memref<128x128xf32, #tpu.memory_space<vmem>>, vector<128x128xf32>
    %cst_26 = arith.constant dense<0.000000e+00> : vector<8x128xf32>
    %72 = tpu.matmul %70, %71, %cst_26 {dimension_numbers = #tpu.dot_dimension_numbers<[1], [0], [0], [1], [0, 0, 1, 1], [], []>} : vector<8x128xf32>, vector<128x128xf32>, vector<8x128xf32> -> vector<8x128xf32>
    %c0_27 = arith.constant 0 : index
    %c0_28 = arith.constant 0 : index
    %73 = vector.load %arg8[%c0_27, %c0_28] : memref<1x128xf32, #tpu.memory_space<vmem>>, vector<1x128xf32>
    %74 = vector.broadcast %73 : vector<1x128xf32> to vector<8x128xf32>
    %75 = arith.addf %72, %74 : vector<8x128xf32>
    %cst_29 = arith.constant 0.000000e+00 : f32
    %76 = vector.broadcast %cst_29 : f32 to vector<8x128xf32>
    %77 = arith.maximumf %75, %76 : vector<8x128xf32>
    %c0_30 = arith.constant 0 : index
    %c0_31 = arith.constant 0 : index
    %78 = vector.load %arg9[%c0_30, %c0_31] : memref<128x128xf32, #tpu.memory_space<vmem>>, vector<128x128xf32>
    %cst_32 = arith.constant dense<0.000000e+00> : vector<8x128xf32>
    %79 = tpu.matmul %77, %78, %cst_32 {dimension_numbers = #tpu.dot_dimension_numbers<[1], [0], [0], [1], [0, 0, 1, 1], [], []>} : vector<8x128xf32>, vector<128x128xf32>, vector<8x128xf32> -> vector<8x128xf32>
    %80 = vector.broadcast %14 : vector<1x128xf32> to vector<8x128xf32>
    %81 = arith.addf %79, %80 : vector<8x128xf32>
    %82 = arith.addf %70, %81 : vector<8x128xf32>
    %83 = vector.broadcast %21 : vector<1x128xf32> to vector<8x128xf32>
    %84 = arith.mulf %82, %83 : vector<8x128xf32>
    %cst_33 = arith.constant dense<0.000000e+00> : vector<8xf32>
    %85 = vector.multi_reduction <add>, %84, %cst_33 [1] : vector<8x128xf32> to vector<8xf32>
    %86 = vector.shape_cast %85 : vector<8xf32> to vector<8x1xf32>
    %cst_34 = arith.constant 3.125000e-02 : f32
    %87 = vector.broadcast %cst_34 : f32 to vector<8x1xf32>
    %88 = arith.mulf %86, %87 : vector<8x1xf32>
    %89 = vector.broadcast %88 : vector<8x1xf32> to vector<8x128xf32>
    %90 = arith.subf %84, %89 : vector<8x128xf32>
    %91 = vector.broadcast %21 : vector<1x128xf32> to vector<8x128xf32>
    %92 = arith.mulf %90, %91 : vector<8x128xf32>
    %93 = arith.mulf %92, %92 : vector<8x128xf32>
    %cst_35 = arith.constant dense<0.000000e+00> : vector<8xf32>
    %94 = vector.multi_reduction <add>, %93, %cst_35 [1] : vector<8x128xf32> to vector<8xf32>
    %95 = vector.shape_cast %94 : vector<8xf32> to vector<8x1xf32>
    %cst_36 = arith.constant 3.125000e-02 : f32
    %96 = vector.broadcast %cst_36 : f32 to vector<8x1xf32>
    %97 = arith.mulf %95, %96 : vector<8x1xf32>
    %cst_37 = arith.constant 9.99999974E-6 : f32
    %98 = vector.broadcast %cst_37 : f32 to vector<8x1xf32>
    %99 = arith.addf %97, %98 : vector<8x1xf32>
    %100 = math.rsqrt %99 : vector<8x1xf32>
    %101 = vector.broadcast %100 : vector<8x1xf32> to vector<8x128xf32>
    %102 = arith.mulf %92, %101 : vector<8x128xf32>
    %103 = vector.broadcast %15 : vector<1x128xf32> to vector<8x128xf32>
    %104 = arith.mulf %102, %103 : vector<8x128xf32>
    %105 = vector.broadcast %16 : vector<1x128xf32> to vector<8x128xf32>
    %106 = arith.addf %104, %105 : vector<8x128xf32>
    %c0_38 = arith.constant 0 : index
    %c0_39 = arith.constant 0 : index
    %107 = vector.load %arg10[%c0_38, %c0_39] : memref<128x128xf32, #tpu.memory_space<vmem>>, vector<128x128xf32>
    %cst_40 = arith.constant dense<0.000000e+00> : vector<8x128xf32>
    %108 = tpu.matmul %106, %107, %cst_40 {dimension_numbers = #tpu.dot_dimension_numbers<[1], [0], [0], [1], [0, 0, 1, 1], [], []>} : vector<8x128xf32>, vector<128x128xf32>, vector<8x128xf32> -> vector<8x128xf32>
    %c0_41 = arith.constant 0 : index
    %c0_42 = arith.constant 0 : index
    %109 = vector.load %arg11[%c0_41, %c0_42] : memref<1x128xf32, #tpu.memory_space<vmem>>, vector<1x128xf32>
    %110 = vector.broadcast %109 : vector<1x128xf32> to vector<8x128xf32>
    %111 = arith.addf %108, %110 : vector<8x128xf32>
    %c0_43 = arith.constant 0 : index
    %c0_44 = arith.constant 0 : index
    %112 = vector.load %arg13[%c0_43, %c0_44] : memref<8x128xf32, #tpu.memory_space<vmem>>, vector<8x128xf32>
    tpu.vector_store %arg13[%c0_43, %c0_44], %111 {strides = array<i32>} : memref<8x128xf32, #tpu.memory_space<vmem>>, vector<8x128xf32>,
    return
  }
  func.func @transform_0(%arg0: i32) -> (i32, i32) {
    %c0_i32 = arith.constant 0 : i32
    %c0_i32_0 = arith.constant 0 : i32
    return %arg0, %c0_i32 : i32, i32
  }
  func.func @transform_1(%arg0: i32) -> (i32, i32) {
    %c0_i32 = arith.constant 0 : i32
    %c0_i32_0 = arith.constant 0 : i32
    %c0_i32_1 = arith.constant 0 : i32
    return %c0_i32, %c0_i32_0 : i32, i32
  }
  func.func @transform_2(%arg0: i32) -> (i32, i32) {
    %c0_i32 = arith.constant 0 : i32
    %c0_i32_0 = arith.constant 0 : i32
    %c0_i32_1 = arith.constant 0 : i32
    return %c0_i32, %c0_i32_0 : i32, i32
  }
  func.func @transform_3(%arg0: i32) -> (i32, i32) {
    %c0_i32 = arith.constant 0 : i32
    %c0_i32_0 = arith.constant 0 : i32
    %c0_i32_1 = arith.constant 0 : i32
    return %c0_i32, %c0_i32_0 : i32, i32
  }
  func.func @transform_4(%arg0: i32) -> (i32, i32) {
    %c0_i32 = arith.constant 0 : i32
    %c0_i32_0 = arith.constant 0 : i32
    %c0_i32_1 = arith.constant 0 : i32
    return %c0_i32, %c0_i32_0 : i32, i32
  }
  func.func @transform_5(%arg0: i32) -> (i32, i32) {
    %c0_i32 = arith.constant 0 : i32
    %c0_i32_0 = arith.constant 0 : i32
    %c0_i32_1 = arith.constant 0 : i32
    return %c0_i32, %c0_i32_0 : i32, i32
  }
  func.func @transform_6(%arg0: i32) -> (i32, i32) {
    %c0_i32 = arith.constant 0 : i32
    %c0_i32_0 = arith.constant 0 : i32
    %c0_i32_1 = arith.constant 0 : i32
    return %c0_i32, %c0_i32_0 : i32, i32
  }
  func.func @transform_7(%arg0: i32) -> (i32, i32) {
    %c0_i32 = arith.constant 0 : i32
    %c0_i32_0 = arith.constant 0 : i32
    %c0_i32_1 = arith.constant 0 : i32
    return %c0_i32, %c0_i32_0 : i32, i32
  }
  func.func @transform_8(%arg0: i32) -> (i32, i32) {
    %c0_i32 = arith.constant 0 : i32
    %c0_i32_0 = arith.constant 0 : i32
    %c0_i32_1 = arith.constant 0 : i32
    return %c0_i32, %c0_i32_0 : i32, i32
  }
  func.func @transform_9(%arg0: i32) -> (i32, i32) {
    %c0_i32 = arith.constant 0 : i32
    %c0_i32_0 = arith.constant 0 : i32
    %c0_i32_1 = arith.constant 0 : i32
    return %c0_i32, %c0_i32_0 : i32, i32
  }
  func.func @transform_10(%arg0: i32) -> (i32, i32) {
    %c0_i32 = arith.constant 0 : i32
    %c0_i32_0 = arith.constant 0 : i32
    %c0_i32_1 = arith.constant 0 : i32
    return %c0_i32, %c0_i32_0 : i32, i32
  }
  func.func @transform_11(%arg0: i32) -> (i32, i32) {
    %c0_i32 = arith.constant 0 : i32
    %c0_i32_0 = arith.constant 0 : i32
    %c0_i32_1 = arith.constant 0 : i32
    return %c0_i32, %c0_i32_0 : i32, i32
  }
  func.func @transform_12(%arg0: i32) -> (i32, i32) {
    %c0_i32 = arith.constant 0 : i32
    %c0_i32_0 = arith.constant 0 : i32
    return %arg0, %c0_i32 : i32, i32
  }
}

</mosaic_0001>

<bundles_post_ra>
// kernel: tpu_custom_call.1
= control target key start
LH: loop header
LB: loop body
LE: loop exit
PB: predicated region body
PF: predicated region fallthrough
CT: control target
= control target key end

     0   :  { %s1763_s0 = inlined_call_operand.vmem [shape: s32[16,1], index: 0, kind: input, shape index: {}]   ;;  %s1764_s1 = inlined_call_operand.hbm [shape: f32[128,128], index: 1, kind: input, shape index: {}]   ;;  %s1765_s2 = inlined_call_operand.vmem [shape: f32[8,128], index: 2, kind: input, shape index: {}]   ;;  %s1766_s3 = inlined_call_operand.hbm [shape: f32[128,384], index: 3, kind: input, shape index: {}]   ;;  %s1767_s4 = inlined_call_operand.vmem [shape: f32[1,384], index: 4, kind: input, shape index: {}]   ;;  %s1768_s5 = inlined_call_operand.hbm [shape: f32[128,128], index: 5, kind: input, shape index: {}]   ;;  %s1769_s6 = inlined_call_operand.hbm [shape: f32[128,128], index: 6, kind: input, shape index: {}]   ;;  %s1770_s7 = inlined_call_operand.vmem [shape: f32[1,128], index: 7, kind: input, shape index: {}]   ;;  %s1771_s8 = inlined_call_operand.hbm [shape: f32[128,128], index: 8, kind: input, shape index: {}]   ;;  %s1772_s9 = inlined_call_operand.hbm [shape: f32[128,128], index: 9, kind: input, shape index: {}]   ;;  %s1773_s10 = inlined_call_operand.vmem [shape: f32[1,128], index: 10, kind: input, shape index: {}]   ;;  %s1774_s11 = inlined_call_operand.vmem [shape: f32[8,128], index: 11, kind: input, shape index: {}]   ;;  %s1775_s12 = inlined_call_operand.hbm [shape: f32[16,128], index: 12, kind: output, shape index: {}]  }
   0x1   :  { %1782 = sst [smem:[#allocation25_spill]] %s1766_s3 }
   0x2   :  { %1783 = sst [smem:[#allocation26_spill]] %s1769_s6 }
   0x3   :  { %1784 = sst [smem:[#allocation27_spill]] %s1773_s10 }
   0x4   :  { %17 = vsyncpa [#allocation3], 0 }
   0x5   :  { %18 = vsyncpa [#allocation6], 0 }
   0x6   :  { %19 = vsyncpa [#allocation9], 0 }
   0x7   :  { %20 = vsyncpa [#allocation12], 0 }
   0x8   :  { %21 = vsyncpa [#allocation4], 0 }
   0x9   :  { %23 = vsyncpa [#allocation4 + $0x1], 0  ;;  %s1570_s21 = smov 0   ;;  %s1572_s22 = smov 0  }
   0xa   :  { %s1574_s23 = smov 0   ;;  %s1576_s24 = smov 0  }
   0xb LB: > { %1785 = sst [smem:[#allocation19_spill]] %s1478_s21  ;;  %s1591_s25 = sadd.s32 4294967295, %s1490_s24   ;;  %s1490_s24 = sphi %s1576_s24, %s1801_s24   ;;  %s1486_s23 = sphi %s1574_s23, %s1803_s23   ;;  %s1482_s22 = sphi %s1572_s22, %s1805_s22   ;;  %s1478_s21 = sphi %s1570_s21, %s1804_s21  }
   0xc   : > { %1786 = sst [smem:[#allocation20_spill]] %s1486_s23  ;;  %s1088_s26 = sadd.s32 4294967294, %s1490_s24  }
   0xd   : > { %1787 = sst [smem:[#allocation21_spill]] %s1490_s24  ;;  %s1595_s27 = sadd.s32 1, %s1490_s24  }
   0xe   : > { %1788 = sst [smem:[#allocation22_spill]] %s1595_s27  ;;  %s293_s28 = sadd.s32 1, %s1486_s23 }
   0xf   : > { %s290_s29 = ssub.s32 %s1490_s24, %s1595_s27  ;;  %p303_p0 = scmp.ne.s32.totalorder %s1486_s23, %s1482_s22 }
  0x10   : > { %p291_p1 = scmp.eq.s32.totalorder %s290_s29, 0  ;;  %p304_p2 = scmp.eq.s32.totalorder %s1591_s25, 1 }
  0x11   : > { %p309_p3 = scmp.ne.s32.totalorder %s1482_s22, %s1478_s21  ;;  %p310_p4 = scmp.eq.s32.totalorder %s1088_s26, 1 }
  0x12   : > { %s1606_s30 = scalar_select %p291_p1, %s1486_s23, %s293_s28  }
  0x13   : > { %p1608_p5 = por %p304_p2, %p303_p0  ;;  %p1612_p6 = por %p310_p4, %p309_p3 }
  0x14   : > { %1789 = sst [smem:[#allocation23_spill]] %s1606_s30  ;;  %p1089_p7 = scmp.ge.s32.totalorder %s1490_s24, 1 }
  0x15   : > { %s1791_s14 = scalar_select %p1612_p6, 1, 0 }
  0x16   : > { %p317_p8 = scmp.lt.s32.totalorder %s1490_s24, 3  ;;  %p1163_p9 = scmp.eq.s32.totalorder %s1591_s25, 0 }
  0x17   : > { %1792 = sst [smem:[#allocation24_spill]] %s1791_s14  ;;  %s1492_s19 = smov [#allocation5]  }
  0x18   : > { %p1619_p10 = pnand %p1089_p7, %p317_p8  ;;  %s1794_s3 = sld [smem:[#allocation25_spill]] }
  0x19   : > { %s347_s20 = sshll.u32 %s1492_s19, 4  ;;  %s1796_s6 = sld [smem:[#allocation26_spill]]  ;;  %s348_s20 = int_to_ptr.vmem [resolvable:$true] %s347_s20 }
  0x1a   : > { %p1140_p11 = pneg %p1619_p10  ;;  %s1493_s16 = smov 384  }
  0x1b   : > { %s1494_s17 = smov 24   ;;  %s328_s14 = sshll.u32 %s1764_s1, 4  ;;  %s329_s14 = int_to_ptr.hbm [resolvable:$true] %s328_s14 }
  0x1c   : > { %p1630_p12 = pnand %p1163_p9, %p1140_p11  ;;  %s1496_s21 = smov 128  }
  0x1d   : > { %s1497_s28 = smov 8   ;;  %s362_s24 = sshll.u32 %s1768_s5, 4  ;;  %s363_s24 = int_to_ptr.hbm [resolvable:$true] %s362_s24 }
  0x1e   : > { %s345_s18 = sshll.u32 %s1794_s3, 4  ;;  %s1495_s3 = smov [#allocation8]   ;;  %s346_s18 = int_to_ptr.hbm [resolvable:$true] %s345_s18 }
  0x1f   : > { %s376_s30 = sshll.u32 %s1796_s6, 4  ;;  %s378_s19 = sshll.u32 %s1495_s3, 4  ;;  %s377_s30 = int_to_ptr.hbm [resolvable:$true] %s376_s30  ;;  %s379_s19 = int_to_ptr.vmem [resolvable:$true] %s378_s19 }
  0x20   : > { %1146 = dma.hbm_to_vmem [thread:$0]  (!%p1630_p12), %s346_s18, 6144, %s348_s20, [#allocation6], %s1493_s16, %s1493_s16, %s1494_s17  }
  0x21   : > { %1152 = dma.hbm_to_vmem [thread:$0]  (!%p1630_p12), %s377_s30, 2048, %s379_s19, [#allocation9], %s1496_s21, %s1496_s21, %s1497_s28  }
  0x22   : > { %s1498_s10 = smov [#allocation2]   ;;  %s1499_s3 = smov [#allocation7]  }
  0x23   : > { %s330_s18 = sshll.u32 %s1498_s10, 4  ;;  %s364_s23 = sshll.u32 %s1499_s3, 4  ;;  %s331_s18 = int_to_ptr.vmem [resolvable:$true] %s330_s18  ;;  %s365_s23 = int_to_ptr.vmem [resolvable:$true] %s364_s23 }
  0x24   : > { %1143 = dma.hbm_to_vmem [thread:$0]  (!%p1630_p12), %s329_s14, 2048, %s331_s18, [#allocation3], %s1496_s21, %s1496_s21, %s1497_s28  }
  0x25   : > { %s393_s16 = sshll.u32 %s1771_s8, 4  ;;  %s407_s17 = sshll.u32 %s1772_s9, 4  ;;  %s394_s16 = int_to_ptr.hbm [resolvable:$true] %s393_s16  ;;  %s408_s17 = int_to_ptr.hbm [resolvable:$true] %s407_s17 }
  0x26   : > { %1149 = dma.hbm_to_vmem [thread:$0]  (!%p1630_p12), %s363_s24, 2048, %s365_s23, [#allocation6], %s1496_s21, %s1496_s21, %s1497_s28  }
  0x27   : > { %s1500_s10 = smov [#allocation10]   ;;  %s1501_s14 = smov [#allocation11]  }
  0x28   : > { %s395_s19 = sshll.u32 %s1500_s10, 4  ;;  %s409_s29 = sshll.u32 %s1501_s14, 4  ;;  %s396_s19 = int_to_ptr.vmem [resolvable:$true] %s395_s19  ;;  %s410_s29 = int_to_ptr.vmem [resolvable:$true] %s409_s29 }
  0x29   : > { %1155 = dma.hbm_to_vmem [thread:$0]  (!%p1630_p12), %s394_s16, 2048, %s396_s19, [#allocation9], %s1496_s21, %s1496_s21, %s1497_s28  }
  0x2a   : > { %1158 = dma.hbm_to_vmem [thread:$0]  (!%p1630_p12), %s408_s17, 2048, %s410_s29, [#allocation12], %s1496_s21, %s1496_s21, %s1497_s28  }
  0x2b   : > { %438 = sbr.rel (%p1619_p10) target bundleno = 2032 (0x7f0), region = 68 }
  0x30   : > { %1457 = dma.done.wait (%p1163_p9), [#allocation3], 2048  }
  0x31   : > { %1459 = vsyncadd (%p1163_p9), [#allocation3], 4294965248 }
  0x32   : > { %1461 = dma.done.wait (%p1163_p9), [#allocation6], 8192  }
  0x33   : > { %1463 = vsyncadd (%p1163_p9), [#allocation6], 4294959104 }
  0x34   : > { %1465 = dma.done.wait (%p1163_p9), [#allocation9], 4096  }
  0x35   : > { %1467 = vsyncadd (%p1163_p9), [#allocation9], 4294963200 }
  0x36   : > { %1469 = dma.done.wait (%p1163_p9), [#allocation12], 2048  }
  0x37   : > { %1471 = vsyncadd (%p1163_p9), [#allocation12], 4294965248  ;;  %p505_p13 = scmp.lt.s32.totalorder %s1591_s25, 1  ;;  %v1502_v0 = vmov 0   ;;  %v533_v2 = vld [vmem:[#allocation2 + $0x78] sm:$0xff]  ;;  %v532_v3 = vld [vmem:[#allocation2 + $0x70] sm:$0xff]  ;;  %v510_v56 = vlaneseq }
  0x38   : > { %1221 = vset.pattern.permute.xlu0 %v1502_v0  ;;  %535 = vmatpush.msra.mxu0 %v533_v2  ;;  %v531_v4 = vld [vmem:[#allocation2 + $0x68] sm:$0xff]  ;;  %v530_v5 = vld [vmem:[#allocation2 + $0x60] sm:$0xff]  ;;  %v529_v6 = vld [vmem:[#allocation2 + $0x58] sm:$0xff]  ;;  %v1503_v63 = vmov 1.0   ;;  %vm695_vm1 = vcmask 64512   ;;  %s502_s17 = sand.u32 1, %s1482_s22  }
  0x39   : > { %s506_s21 = scalar_select %p505_p13, %s1591_s25, 1  ;;  %v528_v7 = vld [vmem:[#allocation2 + $0x50] sm:$0xff]  ;;  %v527_v8 = vld [vmem:[#allocation2 + $0x48] sm:$0xff]  ;;  %v526_v9 = vld [vmem:[#allocation2 + $0x40] sm:$0xff]  ;;  %v1684_v61 = vand.u32 127, %v510_v56 }
  0x3a   : > { %536 = vmatpush.msra.mxu0 %v532_v3  ;;  %v525_v10 = vld [vmem:[#allocation2 + $0x38] sm:$0xff]  ;;  %v524_v11 = vld [vmem:[#allocation2 + $0x30] sm:$0xff]  ;;  %v523_v12 = vld [vmem:[#allocation2 + $0x28] sm:$0xff]  ;;  %s1104_s10 = sshll.u32 %s502_s17, 3  ;;  %s1111_s19 = sshll.u32 %s1591_s25, 3 }
  0x3b   : > { %s1105_s24 = sshll.u32 %s506_s21, 3  ;;  %v522_v13 = vld [vmem:[#allocation2 + $0x20] sm:$0xff]  ;;  %v521_v14 = vld [vmem:[#allocation2 + $0x18] sm:$0xff]  ;;  %v520_v15 = vld [vmem:[#allocation2 + $0x10] sm:$0xff]  ;;  %vm556_vm6 = vcmp.lt.s32.totalorder %v1684_v61, 32  ;;  %s964_s21 = scalar_lea.hbm %s1775_s12, %s1111_s19 }
  0x3c   : > { %s508_s28 = scalar_lea.vmem %s1763_s0, %s1105_s24  ;;  %537 = vmatpush.msra.mxu0 %v531_v4  ;;  %v519_v16 = vld [vmem:[#allocation2 + $0x8] sm:$0xff]  ;;  %v518_v17 = vld [vmem:[#allocation2] sm:$0xff]  ;;  %v605_v19 = vld [vmem:[#allocation5 + $0x170] sm:$0xff]  ;;  %s1797_s26 = sld [smem:[#allocation27_spill]] }
  0x3d   : > { %v509_v1 = vld [vmem:[%s508_s28] sm:$0xff]  ;;  %v604_v18 = vld [vmem:[#allocation5 + $0x168] sm:$0xff]  ;;  %v606_v20 = vld [vmem:[#allocation5 + $0x178] sm:$0xff]  ;;  %635 = vmatpush.msra.mxu2 %v605_v19  ;;  %s504_s28 = scalar_lea.vmem [#allocation13], %s1104_s10  ;;  %s968_s3 = sshll.u32 %s964_s21, 4  ;;  %s969_s3 = int_to_ptr.hbm [resolvable:$true] %s968_s3 }
  0x3e   : > { %513 = vperm.xlu0 %1221, %v509_v1   ;;  %538 = vmatpush.msra.mxu0 %v530_v5  ;;  %v601_v21 = vld [vmem:[#allocation5 + $0x150] sm:$0xff]  ;;  %v602_v22 = vld [vmem:[#allocation5 + $0x158] sm:$0xff]  ;;  %v603_v23 = vld [vmem:[#allocation5 + $0x160] sm:$0xff]  ;;  %s966_s18 = sshll.u32 %s504_s28, 4  ;;  %s954_s23 = scalar_lea.sflag [#allocation4], %s502_s17  ;;  %s967_s18 = int_to_ptr.vmem [resolvable:$true] %s966_s18 }
  0x3f   : > { %615 = vmatpush.msra.mxu1 %v604_v18  ;;  %655 = vmatpush.msra.mxu3 %v606_v20  ;;  %v598_v24 = vld [vmem:[#allocation5 + $0x138] sm:$0xff]  ;;  %v599_v25 = vld [vmem:[#allocation5 + $0x140] sm:$0xff]  ;;  %v600_v26 = vld [vmem:[#allocation5 + $0x148] sm:$0xff]  ;;  %s1426_s27 = sshra.s32 %s969_s3, 4  ;;  %s1432_s6 = scalar_lea.hbm %s1775_s12, 16  ;;  %s1427_s27 = int_to_ptr.hbm [resolvable:$true] %s1426_s27 }
  0x40   : > { %539 = vmatpush.msra.mxu0 %v529_v6  ;;  %636 = vmatpush.msra.mxu2 %v602_v22  ;;  %v595_v27 = vld [vmem:[#allocation5 + $0x120] sm:$0xff]  ;;  %v596_v28 = vld [vmem:[#allocation5 + $0x128] sm:$0xff]  ;;  %v597_v29 = vld [vmem:[#allocation5 + $0x130] sm:$0xff]  ;;  %s1428_s25 = scalar_lea.hbm %s1427_s27, 8  ;;  %p1433_p3 = scmp.lt.s32.totalorder %s1427_s27, %s1775_s12 }
  0x41   : > { %616 = vmatpush.msra.mxu1 %v601_v21  ;;  %656 = vmatpush.msra.mxu3 %v603_v23  ;;  %v592_v30 = vld [vmem:[#allocation5 + $0x108] sm:$0xff]  ;;  %v593_v31 = vld [vmem:[#allocation5 + $0x110] sm:$0xff]  ;;  %v594_v32 = vld [vmem:[#allocation5 + $0x118] sm:$0xff]  ;;  %p1429_p0 = scmp.ne.s32.totalorder %s1427_s27, %s1428_s25  ;;  %p1434_p4 = scmp.lt.s32.totalorder %s1432_s6, %s1428_s25 }
  0x42   : > { %540 = vmatpush.msra.mxu0 %v528_v7  ;;  %637 = vmatpush.msra.mxu2 %v599_v25  ;;  %v589_v33 = vld [vmem:[#allocation5 + $0xf0] sm:$0xff]  ;;  %v590_v34 = vld [vmem:[#allocation5 + $0xf8] sm:$0xff]  ;;  %v591_v35 = vld [vmem:[#allocation5 + $0x100] sm:$0xff] }
  0x43   : > { %617 = vmatpush.msra.mxu1 %v598_v24  ;;  %657 = vmatpush.msra.mxu3 %v600_v26  ;;  %v586_v36 = vld [vmem:[#allocation5 + $0xd8] sm:$0xff]  ;;  %v587_v37 = vld [vmem:[#allocation5 + $0xe0] sm:$0xff]  ;;  %v588_v38 = vld [vmem:[#allocation5 + $0xe8] sm:$0xff]  ;;  %p1430_p1 = pnand %p1429_p0, %p1608_p5  ;;  %p1435_p7 = por %p1434_p4, %p1433_p3 }
  0x44   : > { %541 = vmatpush.msra.mxu0 %v527_v8  ;;  %638 = vmatpush.msra.mxu2 %v596_v28  ;;  %v583_v39 = vld [vmem:[#allocation5 + $0xc0] sm:$0xff]  ;;  %v584_v40 = vld [vmem:[#allocation5 + $0xc8] sm:$0xff]  ;;  %v585_v41 = vld [vmem:[#allocation5 + $0xd0] sm:$0xff] }
  0x45   : > { %618 = vmatpush.msra.mxu1 %v595_v27  ;;  %658 = vmatpush.msra.mxu3 %v597_v29  ;;  %v580_v42 = vld [vmem:[#allocation5 + $0xa8] sm:$0xff]  ;;  %v581_v43 = vld [vmem:[#allocation5 + $0xb0] sm:$0xff]  ;;  %v582_v44 = vld [vmem:[#allocation5 + $0xb8] sm:$0xff]  ;;  %p1431_p2 = pneg %p1430_p1 }
  0x46   : > { %542 = vmatpush.msra.mxu0 %v526_v9  ;;  %639 = vmatpush.msra.mxu2 %v593_v31  ;;  %v577_v45 = vld [vmem:[#allocation5 + $0x90] sm:$0xff]  ;;  %v578_v46 = vld [vmem:[#allocation5 + $0x98] sm:$0xff]  ;;  %v579_v47 = vld [vmem:[#allocation5 + $0xa0] sm:$0xff] }
  0x47   : > { %619 = vmatpush.msra.mxu1 %v592_v30  ;;  %659 = vmatpush.msra.mxu3 %v594_v32  ;;  %v574_v48 = vld [vmem:[#allocation5 + $0x78] sm:$0xff]  ;;  %v575_v49 = vld [vmem:[#allocation5 + $0x80] sm:$0xff]  ;;  %v576_v50 = vld [vmem:[#allocation5 + $0x88] sm:$0xff]  ;;  %p1436_p8 = pnand %p1435_p7, %p1431_p2 }
  0x48   : > { %543 = vmatpush.msra.mxu0 %v525_v10  ;;  %640 = vmatpush.msra.mxu2 %v590_v34  ;;  %v571_v51 = vld [vmem:[#allocation5 + $0x60] sm:$0xff]  ;;  %v572_v52 = vld [vmem:[#allocation5 + $0x68] sm:$0xff]  ;;  %v573_v53 = vld [vmem:[#allocation5 + $0x70] sm:$0xff] }
  0x49   : > { %620 = vmatpush.msra.mxu1 %v589_v33  ;;  %660 = vmatpush.msra.mxu3 %v591_v35  ;;  %v568_v54 = vld [vmem:[#allocation5 + $0x48] sm:$0xff]  ;;  %v569_v55 = vld [vmem:[#allocation5 + $0x50] sm:$0xff]  ;;  %v570_v57 = vld [vmem:[#allocation5 + $0x58] sm:$0xff] }
  0x4a   : > { %544 = vmatpush.msra.mxu0 %v524_v11  ;;  %641 = vmatpush.msra.mxu2 %v587_v37  ;;  %v565_v58 = vld [vmem:[#allocation5 + $0x30] sm:$0xff]  ;;  %v566_v59 = vld [vmem:[#allocation5 + $0x38] sm:$0xff]  ;;  %v567_v60 = vld [vmem:[#allocation5 + $0x40] sm:$0xff] }
  0x4b   : > { %621 = vmatpush.msra.mxu1 %v586_v36  ;;  %661 = vmatpush.msra.mxu3 %v588_v38  ;;  %v562_v0 = vld [vmem:[#allocation5 + $0x18] sm:$0xff]  ;;  %v563_v1 = vld [vmem:[#allocation5 + $0x20] sm:$0xff]  ;;  %v564_v2 = vld [vmem:[#allocation5 + $0x28] sm:$0xff] }
  0x4c   : > { %545 = vmatpush.msra.mxu0 %v523_v12  ;;  %642 = vmatpush.msra.mxu2 %v584_v40  ;;  %v559_v3 = vld [vmem:[#allocation5] sm:$0xff]  ;;  %v560_v4 = vld [vmem:[#allocation5 + $0x8] sm:$0xff]  ;;  %v561_v5 = vld [vmem:[#allocation5 + $0x10] sm:$0xff] }
  0x4d   : > { %622 = vmatpush.msra.mxu1 %v583_v39  ;;  %662 = vmatpush.msra.mxu3 %v585_v41  ;;  %v534_v6 = vld [vmem:[%s1765_s2] sm:$0xff]  ;;  %v758_v26 = vld [vmem:[#allocation7 + $0x78] sm:$0xff]  ;;  %v757_v27 = vld [vmem:[#allocation7 + $0x70] sm:$0xff] }
  0x4e   : > { %546 = vmatpush.msra.mxu0 %v522_v13  ;;  %643 = vmatpush.msra.mxu2 %v581_v43  ;;  %v607_v9 = vld [vmem:[%s1767_s4] sm:$0x7]  ;;  %v756_v28 = vld [vmem:[#allocation7 + $0x68] sm:$0xff]  ;;  %v754_v30 = vld [vmem:[#allocation7 + $0x58] sm:$0xff] }
  0x4f   : > { %623 = vmatpush.msra.mxu1 %v580_v42  ;;  %663 = vmatpush.msra.mxu3 %v582_v44  ;;  %v610_v10 = vperm.slane %v607_v9, 1  ;;  %v611_v11 = vperm.slane %v607_v9, 2  ;;  %v609_v12 = vperm.slane %v607_v9, 0  ;;  %v755_v29 = vld [vmem:[#allocation7 + $0x60] sm:$0xff]  ;;  %v753_v31 = vld [vmem:[#allocation7 + $0x50] sm:$0xff]  ;;  %v752_v32 = vld [vmem:[#allocation7 + $0x48] sm:$0xff] }
  0x50   : > { %547 = vmatpush.msra.mxu0 %v521_v14  ;;  %644 = vmatpush.msra.mxu2 %v578_v46  ;;  %v751_v34 = vld [vmem:[#allocation7 + $0x40] sm:$0xff]  ;;  %v750_v35 = vld [vmem:[#allocation7 + $0x38] sm:$0xff]  ;;  %v749_v36 = vld [vmem:[#allocation7 + $0x30] sm:$0xff] }
  0x51   : > { %624 = vmatpush.msra.mxu1 %v577_v45  ;;  %664 = vmatpush.msra.mxu3 %v579_v47  ;;  %v748_v37 = vld [vmem:[#allocation7 + $0x28] sm:$0xff]  ;;  %v747_v40 = vld [vmem:[#allocation7 + $0x20] sm:$0xff]  ;;  %v746_v42 = vld [vmem:[#allocation7 + $0x18] sm:$0xff] }
  0x52   : > { %548 = vmatpush.msra.mxu0 %v520_v15  ;;  %645 = vmatpush.msra.mxu2 %v575_v49  ;;  %v745_v46 = vld [vmem:[#allocation7 + $0x10] sm:$0xff] }
  0x53   : > { %625 = vmatpush.msra.mxu1 %v574_v48  ;;  %665 = vmatpush.msra.mxu3 %v576_v50  ;;  %v744_v48 = vld [vmem:[#allocation7 + $0x8] sm:$0xff]  ;;  %v817_v9 = vld [vmem:[#allocation8 + $0x50] sm:$0xff] }
  0x54   : > { %549 = vmatpush.msra.mxu0 %v519_v16  ;;  %646 = vmatpush.msra.mxu2 %v572_v52 }
  0x55   : > { %626 = vmatpush.msra.mxu1 %v571_v51  ;;  %666 = vmatpush.msra.mxu3 %v573_v53  ;;  %v743_v53 = vld [vmem:[#allocation7] sm:$0xff] }
  0x56   : > { %550 = vmatpush.msra.mxu0 %v518_v17  ;;  %647 = vmatpush.msra.mxu2 %v569_v55  ;;  %v1704_v55 = vld [vmem:[%s1774_s11] sm:$0xff] }
  0x57   : > { %627 = vmatpush.msra.mxu1 %v568_v54  ;;  %667 = vmatpush.msra.mxu3 %v570_v57  ;;  %v759_v56 = vperm.slane %v1704_v55, 0 }
  0x58   : > { %648 = vmatpush.msra.mxu2 %v566_v59  ;;  %v1504_v59 = vmov 0.0  }
  0x59   : > { %628 = vmatpush.msra.mxu1 %v565_v58  ;;  %668 = vmatpush.msra.mxu3 %v567_v60  ;;  %v1708_v60 = vsel %vm556_vm6, 1.0, %v1504_v59 }
  0x5a   : > { %649 = vmatpush.msra.mxu2 %v563_v1  ;;  %v821_v1 = vld [vmem:[#allocation8 + $0x70] sm:$0xff] }
  0x5b   : > { %629 = vmatpush.msra.mxu1 %v562_v0  ;;  %669 = vmatpush.msra.mxu3 %v564_v2  ;;  %v822_v0 = vld [vmem:[#allocation8 + $0x78] sm:$0xff] }
  0x5c   : > { %650 = vmatpush.msra.mxu2 %v560_v4 }
  0x5d   : > { %630 = vmatpush.msra.mxu1 %v559_v3  ;;  %670 = vmatpush.msra.mxu3 %v561_v5 }
  0x5e   : > { %760 = vmatpush.msrb.mxu2 %v758_v26 }
  0x5f   : > { %827 = vmatpush.msrb.mxu3 %v822_v0  ;;  %v926_v0 = vld [vmem:[#allocation11 + $0x70] sm:$0xff] }
  0x60   : > { %761 = vmatpush.msrb.mxu2 %v757_v27  ;;  %v859_v27 = vld [vmem:[#allocation10 + $0x58] sm:$0xff] }
  0x61   : > { %828 = vmatpush.msrb.mxu3 %v821_v1 }
  0x62   : > { %762 = vmatpush.msrb.mxu2 %v756_v28  ;;  %v858_v28 = vld [vmem:[#allocation10 + $0x50] sm:$0xff] }
  0x64   : > { %763 = vmatpush.msrb.mxu2 %v755_v29  ;;  %v857_v29 = vld [vmem:[#allocation10 + $0x48] sm:$0xff] }
  0x66   : > { %764 = vmatpush.msrb.mxu2 %v754_v30  ;;  %v856_v30 = vld [vmem:[#allocation10 + $0x40] sm:$0xff] }
  0x68   : > { %765 = vmatpush.msrb.mxu2 %v753_v31 }
  0x6a   : > { %766 = vmatpush.msrb.mxu2 %v752_v32  ;;  %v855_v32 = vld [vmem:[#allocation10 + $0x38] sm:$0xff] }
  0x6c   : > { %767 = vmatpush.msrb.mxu2 %v751_v34  ;;  %v854_v34 = vld [vmem:[#allocation10 + $0x30] sm:$0xff] }
  0x6e   : > { %768 = vmatpush.msrb.mxu2 %v750_v35 }
  0x70   : > { %769 = vmatpush.msrb.mxu2 %v749_v36  ;;  %v853_v36 = vld [vmem:[#allocation10 + $0x28] sm:$0xff] }
  0x72   : > { %770 = vmatpush.msrb.mxu2 %v748_v37 }
  0x74   : > { %771 = vmatpush.msrb.mxu2 %v747_v40  ;;  %v851_v40 = vld [vmem:[#allocation10 + $0x18] sm:$0xff] }
  0x76   : > { %772 = vmatpush.msrb.mxu2 %v746_v42  ;;  %v803_v42 = vperm.slane %v1704_v55, 1 }
  0x78   : > { %773 = vmatpush.msrb.mxu2 %v745_v46 }
  0x7a   : > { %774 = vmatpush.msrb.mxu2 %v744_v48  ;;  %v850_v48 = vld [vmem:[#allocation10 + $0x10] sm:$0xff] }
  0x7c   : > { %775 = vmatpush.msrb.mxu2 %v743_v53 }
  0xb0   : > { %v514_v62 = vpop.permute.xlu0 %513 }
  0xb1   : > { %vm515_vm0 = vcmp.eq.s32.totalorder %v514_v62, %v1684_v61 }
  0xb2   : > { %1107 = vmatmul.msk.f32.vlgmr.msra.gmra.mxu0 %vm515_vm0, %v1503_v63 }
 0x12f   : > { %v552_v7 = vpop.f32.mrf.mxu0 }
 0x130   : > { %v1690_v8 = vadd.f32 %v552_v7, %v534_v6  ;;  %v820_v6 = vld [vmem:[#allocation8 + $0x68] sm:$0xff]  ;;  %v819_v7 = vld [vmem:[#allocation8 + $0x60] sm:$0xff] }
 0x131   : > { %829 = vmatpush.msrb.mxu3 %v820_v6  ;;  %v924_v6 = vld [vmem:[#allocation11 + $0x60] sm:$0xff] }
 0x132   : > { %631 = vmatmul.f32.vlgmr.msra.gmra.mxu1 %v1690_v8  ;;  %651 = vmatmul.f32.vlgmr.msra.gmra.mxu2 %v1690_v8 }
 0x133   : > { %671 = vmatmul.f32.vlgmr.msra.gmra.mxu3 %v1690_v8 }
 0x134   : > { %830 = vmatpush.msrb.mxu3 %v819_v7  ;;  %v923_v7 = vld [vmem:[#allocation11 + $0x58] sm:$0xff] }
 0x1af   : > { %v632_v14 = vpop.f32.mrf.mxu1 }
 0x1b0   : > { %v633_v18 = vadd.f32 %v632_v14, %v609_v12  ;;  %v814_v12 = vld [vmem:[#allocation8 + $0x38] sm:$0xff]  ;;  %v812_v14 = vld [vmem:[#allocation8 + $0x28] sm:$0xff] }
 0x1b5   : > { %v652_v13 = vpop.f32.mrf.mxu2 }
 0x1b6   : > { %v653_v15 = vadd.f32 %v652_v13, %v610_v10  ;;  %v672_v16 = vpop.f32.mrf.mxu3  ;;  %v816_v10 = vld [vmem:[#allocation8 + $0x48] sm:$0xff]  ;;  %v813_v13 = vld [vmem:[#allocation8 + $0x30] sm:$0xff] }
 0x1b7   : > { %v673_v17 = vadd.f32 %v672_v16, %v611_v11  ;;  %v815_v11 = vld [vmem:[#allocation8 + $0x40] sm:$0xff]  ;;  %v810_v16 = vld [vmem:[#allocation8 + $0x18] sm:$0xff] }
 0x1b8   : > { %690 = vmatpush.xpose.msrb.mxu0 %v653_v15  ;;  %v811_v15 = vld [vmem:[#allocation8 + $0x20] sm:$0xff] }
 0x1b9   : > { %738 = vmatpush.msrb.mxu1 %v673_v17  ;;  %v809_v17 = vld [vmem:[#allocation8 + $0x10] sm:$0xff] }
 0x1bb   : > { %691 = vmatmul.f32.vlgmr.msrb.gmra.mxu0 %v633_v18  ;;  %v808_v18 = vld [vmem:[#allocation8 + $0x8] sm:$0xff] }
 0x238   : > { %v692_v19 = vpop.f32.mrf.mxu0 }
 0x239   : > { %v696_v20 = vsel %vm695_vm1, %v692_v19, -inf }
 0x23a   : > { %697 = vmax.xlane.f32.xlu0 %v696_v20  ;;  %v863_v20 = vld [vmem:[#allocation10 + $0x78] sm:$0xff] }
 0x23b   : > { %865 = vmatpush.msra.mxu0 %v863_v20 }
 0x2ad   : > { %v698_v21 = vpop.xlane.xlu0 %697 }
 0x2ae   : > { %v699_v22 = vsub.f32 %v692_v19, %v698_v21  ;;  %v807_v19 = vld [vmem:[#allocation8] sm:$0xff]  ;;  %v862_v21 = vld [vmem:[#allocation10 + $0x70] sm:$0xff] }
 0x2af   : > { %866 = vmatpush.msra.mxu0 %v862_v21 }
 0x2b0   : > { %v700_v23 = vmul.f32 1.442695, %v699_v22  ;;  %v861_v22 = vld [vmem:[#allocation10 + $0x68] sm:$0xff] }
 0x2b1   : > { %867 = vmatpush.msra.mxu0 %v861_v22 }
 0x2b2   : > { %1224 = vpow2.f32 %v700_v23 }
 0x2b8   : > { %v1225_v24 = vpop.eup %1224 }
 0x2b9   : > { %v702_v25 = vsel %vm695_vm1, %v1225_v24, 0.0 }
 0x2ba   : > { %703 = vadd.xlane.f32.xlu1 %v702_v25  ;;  %v860_v25 = vld [vmem:[#allocation10 + $0x60] sm:$0xff] }
 0x2bb   : > { %868 = vmatpush.msra.mxu0 %v860_v25 }
 0x2bd   : > { %869 = vmatpush.msra.mxu0 %v859_v27  ;;  %v908_v27 = vperm.slane %v1704_v55, 4 }
 0x2bf   : > { %870 = vmatpush.msra.mxu0 %v858_v28 }
 0x2c1   : > { %871 = vmatpush.msra.mxu0 %v857_v29 }
 0x2c3   : > { %872 = vmatpush.msra.mxu0 %v856_v30  ;;  %v910_v30 = vperm.slane %v1704_v55, 5 }
 0x2c5   : > { %873 = vmatpush.msra.mxu0 %v855_v32 }
 0x2c7   : > { %874 = vmatpush.msra.mxu0 %v854_v34 }
 0x2c9   : > { %875 = vmatpush.msra.mxu0 %v853_v36 }
 0x32d   : > { %v704_v33 = vpop.xlane.xlu1 %703 }
 0x32e   : > { %1226 = vrcp.f32 %v704_v33  ;;  %v716_v43 = vand.u32 2147483648, %v704_v33  ;;  %v714_v45 = vand.u32 2147483647, %v704_v33  ;;  %vm710_vm3 = vweird.f32 %v704_v33 }
 0x330   : > { %v717_v49 = vor.u32 1.1754944e-38, %v716_v43  ;;  %vm715_vm5 = vcmp.eq.f32.partialorder %v714_v45, 8.507059e+37  ;;  %v805_v45 = vperm.slane %v1704_v55, 2 }
 0x334   : > { %v1227_v38 = vpop.eup %1226 }
 0x335   : > { %v706_v39 = vmul.f32 %v1227_v38, %v704_v33  ;;  %vm711_vm2 = vweird.f32 %v1227_v38 }
 0x336   : > { %vm712_vm4 = vmor %vm710_vm3, %vm711_vm2 }
 0x337   : > { %v707_v41 = vsub.f32 1.0, %v706_v39 }
 0x339   : > { %v708_v44 = vmul.f32 %v1227_v38, %v707_v41 }
 0x33b   : > { %v709_v47 = vadd.f32 %v1227_v38, %v708_v44 }
 0x33d   : > { %v713_v50 = vsel %vm712_vm4, %v1227_v38, %v709_v47  ;;  %v852_v38 = vld [vmem:[#allocation10 + $0x20] sm:$0xff] }
 0x33e   : > { %v718_v51 = vsel %vm715_vm5, %v717_v49, %v713_v50  ;;  %876 = vmatpush.msra.mxu0 %v852_v38  ;;  %v849_v49 = vld [vmem:[#allocation10 + $0x8] sm:$0xff]  ;;  %v848_v50 = vld [vmem:[#allocation10] sm:$0xff] }
 0x33f   : > { %v719_v52 = vmul.f32 %v1225_v24, %v718_v51  ;;  %v1222_v51 = vld [vmem:[%s1770_s7] ss:$0 sm:$0xff] }
 0x340   : > { %877 = vmatpush.msra.mxu0 %v851_v40 }
 0x341   : > { %1109 = vmatmul.msk.f32.vlgmr.msrb.gmra.mxu1 %vm695_vm1, %v719_v52 }
 0x342   : > { %878 = vmatpush.msra.mxu0 %v850_v48 }
 0x344   : > { %879 = vmatpush.msra.mxu0 %v849_v49 }
 0x346   : > { %880 = vmatpush.msra.mxu0 %v848_v50 }
 0x3be   : > { %v740_v54 = vpop.f32.mrf.mxu1 }
 0x3bf   : > { %776 = vmatmul.f32.vlgmr.msrb.gmra.mxu2 %v740_v54 }
 0x442   : > { %v777_v57 = vpop.f32.mrf.mxu2 }
 0x443   : > { %v778_v58 = vadd.f32 %v777_v57, %v759_v56  ;;  %v864_v56 = vperm.slane %v1704_v55, 3 }
 0x445   : > { %v780_v62 = vadd.f32 %v778_v58, %v1690_v8  ;;  %v818_v8 = vld [vmem:[#allocation8 + $0x58] sm:$0xff] }
 0x446   : > { %831 = vmatpush.msrb.mxu3 %v818_v8  ;;  %v922_v8 = vld [vmem:[#allocation11 + $0x50] sm:$0xff] }
 0x447   : > { %v781_v63 = vmul.f32 %v1708_v60, %v780_v62 }
 0x448   : > { %832 = vmatpush.msrb.mxu3 %v817_v9  ;;  %v921_v9 = vld [vmem:[#allocation11 + $0x48] sm:$0xff] }
 0x449   : > { %782 = vadd.xlane.f32.xlu1 %v781_v63 }
 0x44a   : > { %833 = vmatpush.msrb.mxu3 %v816_v10  ;;  %v920_v10 = vld [vmem:[#allocation11 + $0x40] sm:$0xff] }
 0x44c   : > { %834 = vmatpush.msrb.mxu3 %v815_v11  ;;  %v919_v11 = vld [vmem:[#allocation11 + $0x38] sm:$0xff] }
 0x44e   : > { %835 = vmatpush.msrb.mxu3 %v814_v12  ;;  %v918_v12 = vld [vmem:[#allocation11 + $0x30] sm:$0xff] }
 0x450   : > { %836 = vmatpush.msrb.mxu3 %v813_v13  ;;  %v917_v13 = vld [vmem:[#allocation11 + $0x28] sm:$0xff] }
 0x452   : > { %837 = vmatpush.msrb.mxu3 %v812_v14  ;;  %v915_v14 = vld [vmem:[#allocation11 + $0x18] sm:$0xff] }
 0x454   : > { %838 = vmatpush.msrb.mxu3 %v811_v15  ;;  %v914_v15 = vld [vmem:[#allocation11 + $0x10] sm:$0xff] }
 0x456   : > { %839 = vmatpush.msrb.mxu3 %v810_v16  ;;  %v913_v16 = vld [vmem:[#allocation11 + $0x8] sm:$0xff] }
 0x458   : > { %840 = vmatpush.msrb.mxu3 %v809_v17  ;;  %v912_v17 = vld [vmem:[#allocation11] sm:$0xff] }
 0x45a   : > { %841 = vmatpush.msrb.mxu3 %v808_v18 }
 0x45c   : > { %842 = vmatpush.msrb.mxu3 %v807_v19 }
 0x4bc   : > { %v783_v2 = vpop.xlane.xlu1 %782 }
 0x4bd   : > { %v784_v3 = vmul.f32 0.03125, %v783_v2 }
 0x4bf   : > { %v785_v4 = vsub.f32 %v781_v63, %v784_v3  ;;  %v927_v63 = vld [vmem:[#allocation11 + $0x78] sm:$0xff] }
 0x4c0   : > { %932 = vmatpush.msra.mxu1 %v927_v63 }
 0x4c1   : > { %v1713_v5 = vmul.f32 %v1708_v60, %v785_v4 }
 0x4c2   : > { %933 = vmatpush.msra.mxu1 %v926_v0 }
 0x4c3   : > { %v787_v61 = vmul.f32 %v1713_v5, %v1713_v5 }
 0x4c5   : > { %788 = vadd.xlane.f32.xlu2 %v787_v61  ;;  %v925_v61 = vld [vmem:[#allocation11 + $0x68] sm:$0xff] }
 0x4c6   : > { %934 = vmatpush.msra.mxu1 %v925_v61 }
 0x4c8   : > { %935 = vmatpush.msra.mxu1 %v924_v6 }
 0x4ca   : > { %936 = vmatpush.msra.mxu1 %v923_v7 }
 0x4cc   : > { %937 = vmatpush.msra.mxu1 %v922_v8 }
 0x4ce   : > { %938 = vmatpush.msra.mxu1 %v921_v9 }
 0x4d0   : > { %939 = vmatpush.msra.mxu1 %v920_v10 }
 0x4d2   : > { %940 = vmatpush.msra.mxu1 %v919_v11 }
 0x4d4   : > { %941 = vmatpush.msra.mxu1 %v918_v12 }
 0x4d6   : > { %942 = vmatpush.msra.mxu1 %v917_v13 }
 0x538   : > { %v789_v23 = vpop.xlane.xlu2 %788 }
 0x539   : > { %v790_v24 = vmul.f32 0.03125, %v789_v23 }
 0x53b   : > { %v791_v26 = vadd.f32 1e-05, %v790_v24 }
 0x53d   : > { %1228 = vrsqrt.f32 %v791_v26  ;;  %vm798_vm8 = vweird.f32 %v791_v26 }
 0x543   : > { %v1229_v31 = vpop.eup %1228 }
 0x544   : > { %v793_v33 = vmul.f32 %v1229_v31, %v791_v26  ;;  %vm799_vm7 = vweird.f32 %v1229_v31 }
 0x545   : > { %vm800_vm9 = vmor %vm798_vm8, %vm799_vm7 }
 0x546   : > { %v794_v35 = vmul.f32 %v1229_v31, %v793_v33  ;;  %v1223_v33 = vld [vmem:[%s1797_s26] ss:$0 sm:$0xff] }
 0x548   : > { %v795_v37 = vmul.f32 0.5, %v794_v35 }
 0x54a   : > { %v796_v39 = vsub.f32 1.5, %v795_v37 }
 0x54c   : > { %v797_v41 = vmul.f32 %v1229_v31, %v796_v39 }
 0x54e   : > { %v801_v43 = vsel %vm800_vm9, %v1229_v31, %v797_v41 }
 0x54f   : > { %v802_v44 = vmul.f32 %v801_v43, %v1713_v5 }
 0x551   : > { %v804_v46 = vmul.f32 %v803_v42, %v802_v44 }
 0x553   : > { %v806_v47 = vadd.f32 %v805_v45, %v804_v46 }
 0x555   : > { %843 = vmatmul.f32.vlgmr.msrb.gmra.mxu3 %v806_v47 }
 0x5d8   : > { %v844_v52 = vpop.f32.mrf.mxu3 }
 0x5d9   : > { %v845_v53 = vadd.f32 %v1222_v51, %v844_v52 }
 0x5db   : > { %v847_v54 = vmax.f32 %v845_v53, 0.0 }
 0x5dd   : > { %881 = vmatmul.f32.vlgmr.msra.gmra.mxu0 %v847_v54 }
 0x65a   : > { %v882_v57 = vpop.f32.mrf.mxu0 }
 0x65b   : > { %v883_v58 = vadd.f32 %v882_v57, %v864_v56 }
 0x65d   : > { %v885_v59 = vadd.f32 %v883_v58, %v806_v47 }
 0x65f   : > { %v886_v62 = vmul.f32 %v1708_v60, %v885_v59 }
 0x661   : > { %887 = vadd.xlane.f32.xlu2 %v886_v62 }
 0x6d4   : > { %v888_v1 = vpop.xlane.xlu2 %887 }
 0x6d5   : > { %v889_v2 = vmul.f32 0.03125, %v888_v1 }
 0x6d7   : > { %v890_v3 = vsub.f32 %v886_v62, %v889_v2 }
 0x6d9   : > { %v891_v4 = vmul.f32 %v1708_v60, %v890_v3  ;;  %v916_v60 = vld [vmem:[#allocation11 + $0x20] sm:$0xff] }
 0x6da   : > { %943 = vmatpush.msra.mxu1 %v916_v60 }
 0x6db   : > { %v892_v5 = vmul.f32 %v891_v4, %v891_v4 }
 0x6dc   : > { %944 = vmatpush.msra.mxu1 %v915_v14 }
 0x6dd   : > { %893 = vadd.xlane.f32.xlu1 %v892_v5 }
 0x6de   : > { %945 = vmatpush.msra.mxu1 %v914_v15 }
 0x6e0   : > { %946 = vmatpush.msra.mxu1 %v913_v16 }
 0x6e2   : > { %947 = vmatpush.msra.mxu1 %v912_v17 }
 0x750   : > { %v894_v18 = vpop.xlane.xlu1 %893 }
 0x751   : > { %v895_v19 = vmul.f32 0.03125, %v894_v18 }
 0x753   : > { %v896_v20 = vadd.f32 1e-05, %v895_v19 }
 0x755   : > { %1230 = vrsqrt.f32 %v896_v20  ;;  %vm903_vm11 = vweird.f32 %v896_v20 }
 0x75b   : > { %v1231_v21 = vpop.eup %1230 }
 0x75c   : > { %v898_v22 = vmul.f32 %v1231_v21, %v896_v20  ;;  %vm904_vm10 = vweird.f32 %v1231_v21 }
 0x75d   : > { %vm905_vm12 = vmor %vm903_vm11, %vm904_vm10 }
 0x75e   : > { %v899_v23 = vmul.f32 %v1231_v21, %v898_v22 }
 0x760   : > { %v900_v24 = vmul.f32 0.5, %v899_v23 }
 0x762   : > { %v901_v25 = vsub.f32 1.5, %v900_v24 }
 0x764   : > { %v902_v26 = vmul.f32 %v1231_v21, %v901_v25 }
 0x766   : > { %v906_v28 = vsel %vm905_vm12, %v1231_v21, %v902_v26 }
 0x767   : > { %v907_v29 = vmul.f32 %v906_v28, %v891_v4 }
 0x769   : > { %v909_v31 = vmul.f32 %v908_v27, %v907_v29 }
 0x76b   : > { %v911_v32 = vadd.f32 %v910_v30, %v909_v31 }
 0x76d   : > { %948 = vmatmul.f32.vlgmr.msra.gmra.mxu1 %v911_v32 }
 0x7ea   : > { %v949_v34 = vpop.f32.mrf.mxu1 }
 0x7eb   : > { %v950_v55 = vadd.f32 %v1223_v33, %v949_v34 }
 0x7ed   : > { %952 = vst [vmem:[%s504_s28] sm:$0xff] %v950_v55 }
 0x7ee   : > { %1439 = shalt.err (!%p1436_p8)
}
 0x7ef   : > { %1138 = dma.vmem_to_hbm [thread:$0]  (%p1608_p5), %s967_s18, 128, %s969_s3, %s954_s23  }
 0x7f0 PF: > { %s1798_s17 = sld [smem:[#allocation21_spill]] }
 0x7f1   : > { %s1799_s19 = sld [smem:[#allocation19_spill]] }
 0x7f6   : > { %p1175_p9 = scmp.ge.s32.totalorder %s1798_s17, 2 }
 0x7f7   : > { %s980_s29 = sand.u32 1, %s1799_s19  }
 0x7f8   : > { %p1160_p10 = pnand %p1175_p9, %p1612_p6  ;;  %s981_s21 = scalar_lea.sflag [#allocation4], %s980_s29 }
 0x7fa   : > { %p1161_p11 = pneg %p1160_p10 }
 0x7fc   : > { %1473 = dma.done.wait (%p1161_p11), %s981_s21, 128  }
 0x7fd   : > { %1475 = vsyncadd (%p1161_p11), %s981_s21, 4294967168  ;;  %s1801_s24 = sld [smem:[#allocation22_spill]]  ;;  %s1804_s21 = smov %s1482_s22 }
 0x7fe   : > { %s1802_s15 = sld [smem:[#allocation20_spill]] }
 0x7ff   : > { %s1803_s23 = sld [smem:[#allocation23_spill]] }
 0x803   : > { %p26_p12 = scmp.ge.s32.totalorder %s1801_s24, 4  }
 0x804   : > { %s1805_s22 = smov %s1802_s15 }
 0x805   :  { %28 = sbr.rel (!%p26_p12) target bundleno = 11 (0xb), region = 128 }
 0x80a   :  { %987 = vsyncpa [#allocation3], 1 }
 0x80b   :  { %989 = vsyncpa [#allocation3 + $0x1], 1 }
 0x80c   :  { %990 = vsyncpa [#allocation6], 1 }
 0x80d   :  { %991 = vsyncpa [#allocation9], 1 }
 0x80e   :  { %992 = vsyncpa [#allocation12], 1 }
 0x80f   :  { %993 = vsyncpa [#allocation4], 1 }
 0x810   :  { %995 = vsyncpa [#allocation4 + $0x1], 1 }

</bundles_post_ra>
